<compile_context>
chip_gen: v6e
topology: v6e:2x2x1
jax: 0.10.0
libtpu: 0.0.40
codegen_flags: <defaults>
</compile_context>

<pallas_src>
import functools

import jax
import jax.numpy as jnp
from jax import lax
from jax.experimental import pallas as pl
from jax.experimental.pallas import tpu as pltpu

ALPHA = 1.0
GAMMA = 2.0
LANES = 128
TARGET_TILE_ROWS = 1024  # 1024 x 128 f32 = 512 KiB per input block


def _stable_bce_with_logits(x, t):
    # Numerically-stable BCE with logits: max(x,0) - x*t + log(1 + exp(-|x|))
    return jnp.maximum(x, 0.0) - x * t + jnp.log1p(jnp.exp(-jnp.abs(x)))


def _bce_partial_kernel(x_ref, t_ref, out_ref, *, tile_rows, valid_rows, needs_mask):
    x = x_ref[...].astype(jnp.float32)
    t = t_ref[...].astype(jnp.float32)
    bce = _stable_bce_with_logits(x, t)

    if needs_mask:
        # Only the last (partial) block actually needs this; it is a couple of
        # VPU ops per element and fully hidden behind HBM traffic.
        step = pl.program_id(0)
        row = lax.broadcasted_iota(jnp.int32, bce.shape, 0) + step * tile_rows
        bce = jnp.where(row < valid_rows, bce, 0.0)

    # (tile_rows, 128) -> (8, 128) sublane-group partial sum: stays on the VPU
    # (vreg-aligned reshape + adds).  The single cross-lane reduction is
    # deferred to the wrapper, once, over a tiny array.
    out_ref[0] = jnp.sum(bce.reshape(tile_rows // 8, 8, LANES), axis=0)


def binary_focal_with_logits_loss(inputs, targets, alpha=ALPHA, gamma=GAMMA):
    """inputs/targets: any shape (e.g. NCHW). Returns a scalar float32."""
    # Stream in the native dtype; upcast to f32 inside the kernel.
    # TODO(synk): for strictly-binary masks, targets could be streamed as int8
    # to cut HBM bytes further; kept in the caller's dtype to preserve exact
    # soft-target semantics of F.binary_cross_entropy_with_logits.
    x = jnp.ravel(inputs)
    t = jnp.ravel(targets)
    n = x.shape[0]

    rows_full = n // LANES
    tile_rows = min(TARGET_TILE_ROWS, (rows_full // 8) * 8)

    bce_main = jnp.float32(0.0)
    n_main = 0
    if tile_rows >= 8:
        n_main = rows_full * LANES
        x_main = x if n_main == n else x[:n_main]
        t_main = t if n_main == n else t[:n_main]
        x2 = x_main.reshape(rows_full, LANES)
        t2 = t_main.reshape(rows_full, LANES)

        num_blocks = pl.cdiv(rows_full, tile_rows)
        needs_mask = (rows_full % tile_rows) != 0

        kernel = functools.partial(
            _bce_partial_kernel,
            tile_rows=tile_rows,
            valid_rows=rows_full,
            needs_mask=needs_mask,
        )

        partials = pl.pallas_call(
            kernel,
            out_shape=jax.ShapeDtypeStruct((num_blocks, 8, LANES), jnp.float32),
            grid=(num_blocks,),
            in_specs=[
                pl.BlockSpec((tile_rows, LANES), lambda i: (i, 0)),
                pl.BlockSpec((tile_rows, LANES), lambda i: (i, 0)),
            ],
            out_specs=pl.BlockSpec((1, 8, LANES), lambda i: (i, 0, 0)),
            compiler_params=pltpu.CompilerParams(
                dimension_semantics=("parallel",)
            ),
        )(x2, t2)
        bce_main = jnp.sum(partials)

    # Tail (< 128 elements, or everything if the input is tiny): plain JAX.
    if n_main < n:
        xr = x[n_main:].astype(jnp.float32)
        tr = t[n_main:].astype(jnp.float32)
        bce_tail = jnp.sum(_stable_bce_with_logits(xr, tr))
    else:
        bce_tail = jnp.float32(0.0)

    bce_sum = bce_main + bce_tail
    p = jnp.exp(-bce_sum)
    omp = 1.0 - p
    focal_w = omp * omp if gamma == 2 else omp ** gamma
    # reduction='sum' of a scalar loss == the scalar itself
    return (alpha * focal_w * bce_sum).astype(jnp.float32)


def _reference(inputs, targets, alpha=ALPHA, gamma=GAMMA):
    x = inputs.astype(jnp.float32)
    t = targets.astype(jnp.float32)
    bce = jnp.sum(jnp.maximum(x, 0.0) - x * t + jnp.log1p(jnp.exp(-jnp.abs(x))))
    p = jnp.exp(-bce)
    return alpha * (1.0 - p) ** gamma * bce


if __name__ == "__main__":
    key = jax.random.PRNGKey(0)
    k1, k2 = jax.random.split(key)
    # NCHW input, matching the conv-style layout convention of the module
    shape = (2, 4, 16, 16)
    logits = jax.random.normal(k1, shape, dtype=jnp.float32)
    targets = (jax.random.uniform(k2, shape) > 0.5).astype(jnp.float32)

    loss = binary_focal_with_logits_loss(logits, targets)
    loss = jax.block_until_ready(loss)

    ref = _reference(logits, targets)
    assert jnp.allclose(loss, ref, rtol=1e-5, atol=1e-5), (loss, ref)
    print("KERNEL_OK")
</pallas_src>

<mosaic_0001>
module attributes {stable_mosaic.version = 11 : i64} {
  func.func @_bce_partial_kernel(%arg0: i32, %arg1: memref<16x128xf32, #tpu.memory_space<vmem>>, %arg2: memref<16x128xf32, #tpu.memory_space<vmem>>, %arg3: memref<1x8x128xf32, #tpu.memory_space<vmem>>) attributes {dimension_semantics = [#tpu.dimension_semantics<parallel>], iteration_bounds = array<i64: 1>, scalar_prefetch = 0 : i64, scratch_operands = 0 : i64, tpu.core_type = #tpu.core_type<tc>, window_params = [{transform_indices = @transform_0, window_bounds = array<i64: 16, 128>}, {transform_indices = @transform_1, window_bounds = array<i64: 16, 128>}, {transform_indices = @transform_2, window_bounds = array<i64: 1, 8, 128>}]} {
    %c0 = arith.constant 0 : index
    %c0_0 = arith.constant 0 : index
    %0 = vector.load %arg1[%c0, %c0_0] : memref<16x128xf32, #tpu.memory_space<vmem>>, vector<16x128xf32>
    %c0_1 = arith.constant 0 : index
    %c0_2 = arith.constant 0 : index
    %1 = vector.load %arg2[%c0_1, %c0_2] : memref<16x128xf32, #tpu.memory_space<vmem>>, vector<16x128xf32>
    %cst = arith.constant 0.000000e+00 : f32
    %2 = vector.broadcast %cst : f32 to vector<16x128xf32>
    %3 = arith.maximumf %0, %2 : vector<16x128xf32>
    %4 = arith.mulf %0, %1 : vector<16x128xf32>
    %5 = arith.subf %3, %4 : vector<16x128xf32>
    %6 = math.absf %0 : vector<16x128xf32>
    %cst_3 = arith.constant 0.000000e+00 : f32
    %7 = vector.broadcast %cst_3 : f32 to vector<16x128xf32>
    %8 = arith.subf %7, %6 : vector<16x128xf32>
    %9 = math.exp %8 : vector<16x128xf32>
    %10 = math.log1p %9 : vector<16x128xf32>
    %11 = arith.addf %5, %10 : vector<16x128xf32>
    %12 = vector.shape_cast %11 : vector<16x128xf32> to vector<2x8x128xf32>
    %cst_4 = arith.constant dense<0.000000e+00> : vector<8x128xf32>
    %13 = vector.multi_reduction <add>, %12, %cst_4 [0] : vector<2x8x128xf32> to vector<8x128xf32>
    %c0_5 = arith.constant 0 : index
    %c0_6 = arith.constant 0 : index
    %c0_7 = arith.constant 0 : index
    %14 = vector.load %arg3[%c0_5, %c0_6, %c0_7] : memref<1x8x128xf32, #tpu.memory_space<vmem>>, vector<1x8x128xf32>
    %15 = vector.shape_cast %14 : vector<1x8x128xf32> to vector<8x128xf32>
    %16 = vector.shape_cast %13 : vector<8x128xf32> to vector<1x8x128xf32>
    tpu.vector_store %arg3[%c0_5, %c0_6, %c0_7], %16 {strides = array<i32>} : memref<1x8x128xf32, #tpu.memory_space<vmem>>, vector<1x8x128xf32>,
    return
  }
  func.func @transform_0(%arg0: i32) -> (i32, i32) {
    %c0_i32 = arith.constant 0 : i32
    %c0_i32_0 = arith.constant 0 : i32
    return %arg0, %c0_i32 : i32, i32
  }
  func.func @transform_1(%arg0: i32) -> (i32, i32) {
    %c0_i32 = arith.constant 0 : i32
    %c0_i32_0 = arith.constant 0 : i32
    return %arg0, %c0_i32 : i32, i32
  }
  func.func @transform_2(%arg0: i32) -> (i32, i32, i32) {
    %c0_i32 = arith.constant 0 : i32
    %c0_i32_0 = arith.constant 0 : i32
    %c0_i32_1 = arith.constant 0 : i32
    return %arg0, %c0_i32, %c0_i32_0 : i32, i32, i32
  }
}

</mosaic_0001>

<bundles_post_ra>
// kernel: tpu_custom_call.1
= control target key start
LH: loop header
LB: loop body
LE: loop exit
PB: predicated region body
PF: predicated region fallthrough
CT: control target
= control target key end

     0   :  { %7 = vsyncpa [#allocation3], 0  ;;  %s204_s0 = inlined_call_operand.hbm [shape: f32[16,128], index: 0, kind: input, shape index: {}]   ;;  %s205_s1 = inlined_call_operand.hbm [shape: f32[16,128], index: 1, kind: input, shape index: {}]   ;;  %s206_s2 = inlined_call_operand.hbm [shape: f32[1,8,128], index: 2, kind: output, shape index: {}]  }
   0x1   :  { %8 = vsyncpa [#allocation6], 0 }
   0x2   :  { %9 = vsyncpa [#allocation4], 0  ;;  %s175_s9 = smov [#allocation2]  }
   0x3   :  { %s15_s10 = sshll.u32 %s175_s9, 4  ;;  %s16_s10 = int_to_ptr.vmem [resolvable:$true] %s15_s10 }
   0x4   :  { %s117_s11 = scalar_lea.vmem %s16_s10, 256  ;;  %p122_p1 = scmp.lt.s32.totalorder %s16_s10, %s16_s10 }
   0x5   :  { %p118_p0 = scmp.ne.s32.totalorder %s16_s10, %s117_s11  ;;  %p123_p2 = scmp.lt.s32.totalorder %s117_s11, %s117_s11 }
   0x7   :  { %p124_p3 = por %p123_p2, %p122_p1 }
   0x9   :  { %p125_p4 = pnand %p124_p3, %p118_p0 }
   0xb   :  { %128 = shalt.err (!%p125_p4)
}
   0xc   :  { %s176_s12 = smov 128   ;;  %s177_s13 = smov 8  }
   0xd   :  { %21 = dma.hbm_to_vmem [thread:$0]  %s204_s0, 256, %s16_s10, [#allocation3], %s176_s12, %s176_s12, %s177_s13  }
   0xe   :  { %s178_s16 = smov [#allocation5]  }
   0xf   :  { %s27_s17 = sshll.u32 %s178_s16, 4  ;;  %s28_s17 = int_to_ptr.vmem [resolvable:$true] %s27_s17 }
  0x10   :  { %s137_s18 = scalar_lea.vmem %s28_s17, 256  ;;  %p142_p6 = scmp.lt.s32.totalorder %s28_s17, %s28_s17 }
  0x11   :  { %p138_p5 = scmp.ne.s32.totalorder %s28_s17, %s137_s18  ;;  %p143_p7 = scmp.lt.s32.totalorder %s137_s18, %s137_s18 }
  0x13   :  { %p144_p8 = por %p143_p7, %p142_p6 }
  0x15   :  { %p145_p9 = pnand %p144_p8, %p138_p5 }
  0x17   :  { %148 = shalt.err (!%p145_p9)
}
  0x18   :  { %33 = dma.hbm_to_vmem [thread:$0]  %s205_s1, 256, %s28_s17, [#allocation6], %s176_s12, %s176_s12, %s177_s13  }
  0x19   :  { %169 = dma.done.wait [#allocation3], 256  }
  0x1a   :  { %170 = vsyncadd [#allocation3], 4294967040 }
  0x1b   :  { %171 = dma.done.wait [#allocation6], 256  }
  0x1c   :  { %172 = vsyncadd [#allocation6], 4294967040  ;;  %v40_v0 = vld [vmem:[#allocation2] sm:$0xff]  ;;  %v41_v1 = vld [vmem:[#allocation2 + $0x8] sm:$0xff]  ;;  %s179_s0 = smov [#allocation7]  }
  0x1d   :  { %v50_v2 = vand.u32 2147483647, %v40_v0  ;;  %v51_v3 = vand.u32 2147483647, %v41_v1  ;;  %v42_v14 = vld [vmem:[#allocation5] sm:$0xff]  ;;  %v43_v15 = vld [vmem:[#allocation5 + $0x8] sm:$0xff] }
  0x1e   :  { %v44_v17 = vmax.f32 %v40_v0, 0.0  ;;  %v46_v18 = vmul.f32 %v42_v14, %v40_v0  ;;  %v45_v21 = vmax.f32 %v41_v1, 0.0  ;;  %v47_v22 = vmul.f32 %v43_v15, %v41_v1  ;;  %s86_s1 = sshll.u32 %s179_s0, 4  ;;  %s87_s1 = int_to_ptr.vmem [resolvable:$true] %s86_s1 }
  0x1f   :  { %v52_v4 = vsub.f32 0.0, %v50_v2  ;;  %v53_v5 = vsub.f32 0.0, %v51_v3  ;;  %s149_s21 = scalar_lea.vmem %s87_s1, 128  ;;  %p154_p11 = scmp.lt.s32.totalorder %s87_s1, %s87_s1 }
  0x20   :  { %v48_v26 = vsub.f32 %v44_v17, %v46_v18  ;;  %v49_v29 = vsub.f32 %v45_v21, %v47_v22  ;;  %p150_p10 = scmp.ne.s32.totalorder %s87_s1, %s149_s21  ;;  %p155_p12 = scmp.lt.s32.totalorder %s149_s21, %s149_s21 }
  0x21   :  { %v54_v6 = vmul.f32 1.442695, %v52_v4  ;;  %v56_v7 = vmul.f32 1.442695, %v53_v5 }
  0x22   :  { %p156_p13 = por %p155_p12, %p154_p11 }
  0x23   :  { %101 = vpow2.f32 %v54_v6 }
  0x24   :  { %103 = vpow2.f32 %v56_v7  ;;  %p157_p0 = pnand %p156_p13, %p150_p10 }
  0x30   :  { %v102_v8 = vpop.eup %101 }
  0x31   :  { %v104_v9 = vpop.eup %103  ;;  %v58_v10 = vadd.f32 1.0, %v102_v8  ;;  %v61_v12 = vmul.f32 -0.5, %v102_v8  ;;  %v64_v19 = vand.u32 2147483647, %v102_v8 }
  0x32   :  { %v67_v11 = vadd.f32 1.0, %v104_v9  ;;  %v70_v13 = vmul.f32 -0.5, %v104_v9  ;;  %v73_v23 = vand.u32 2147483647, %v104_v9 }
  0x33   :  { %105 = vlog2.f32 %v58_v10  ;;  %v62_v16 = vadd.f32 1.0, %v61_v12  ;;  %vm65_vm0 = vcmp.lt.f32.partialorder %v64_v19, 0.0004427343 }
  0x34   :  { %107 = vlog2.f32 %v67_v11  ;;  %v71_v20 = vadd.f32 1.0, %v70_v13  ;;  %vm74_vm1 = vcmp.lt.f32.partialorder %v73_v23, 0.0004427343 }
  0x35   :  { %v63_v24 = vmul.f32 %v102_v8, %v62_v16 }
  0x36   :  { %v72_v27 = vmul.f32 %v104_v9, %v71_v20 }
  0x40   :  { %v106_v25 = vpop.eup %105 }
  0x41   :  { %v108_v28 = vpop.eup %107  ;;  %v60_v30 = vmul.f32 0.6931472, %v106_v25 }
  0x42   :  { %v69_v31 = vmul.f32 0.6931472, %v108_v28 }
  0x43   :  { %v66_v32 = vsel %vm65_vm0, %v63_v24, %v60_v30 }
  0x44   :  { %v75_v33 = vsel %vm74_vm1, %v72_v27, %v69_v31  ;;  %v76_v34 = vadd.f32 %v66_v32, %v48_v26 }
  0x45   :  { %v77_v35 = vadd.f32 %v75_v33, %v49_v29 }
  0x47   :  { %v78_v36 = vadd.f32 %v77_v35, %v76_v34 }
  0x49   :  { %79 = vst [vmem:[#allocation7] sm:$0xff] %v78_v36 }
  0x4a   :  { %160 = shalt.err (!%p157_p0)
}
  0x4b   :  { %89 = dma.vmem_to_hbm [thread:$0]  %s87_s1, 128, %s206_s2, [#allocation4]  }
  0x4c   :  { %173 = dma.done.wait [#allocation4], 128  }
  0x4d   :  { %174 = vsyncadd [#allocation4], 4294967168 }
  0x4e   :  { %93 = vsyncpa [#allocation3], 1 }
  0x4f   :  { %94 = vsyncpa [#allocation6], 1 }
  0x50   :  { %95 = vsyncpa [#allocation4], 1 }

</bundles_post_ra>
